<compile_context>
chip_gen: v7x
topology: tpu7x:2x2x1
jax: 0.10.0
libtpu: 0.0.40
codegen_flags: <defaults>
</compile_context>

<pallas_src>
import functools
import math

import jax
import jax.numpy as jnp
from jax.experimental import pallas as pl
from jax.experimental.pallas import tpu as pltpu


def _make_mlp_kernel(n_hidden_layers):
    """Whole classifier on one (tile_b, :) batch tile.

    Ref order:
      mol_ref, pro_ref,
      W1_mol, W1_pro, P0,                      # P = [bias; gamma; beta], shape (3, n_inner)
      (W_i, P_i) * (n_hidden_layers - 1),
      Pf,                                       # (2, n_inner): row 0 = final weight, Pf[1, 0] = final bias
      o_ref                                     # (1, tile_b) lane-dense output row
    """

    def _bias_act_norm(h_acc, p_ref):
        # h_acc: (tile_b, n_inner) f32 matmul output (bias not yet added).
        b = p_ref[0:1, :]
        g = p_ref[1:2, :]
        be = p_ref[2:3, :]
        h = h_acc + b
        # LeakyReLU, default negative_slope = 0.01
        h = jnp.where(h >= 0, h, 0.01 * h)
        # LayerNorm(eps=1e-5), fused single-pass statistics
        inv_n = 1.0 / h.shape[-1]
        s1 = jnp.sum(h, axis=-1, keepdims=True)
        s2 = jnp.sum(h * h, axis=-1, keepdims=True)
        mu = s1 * inv_n
        var = jnp.maximum(s2 * inv_n - mu * mu, 0.0)
        h = (h - mu) * jax.lax.rsqrt(var + 1e-5) * g + be
        # Dropout(0.1): identity in eval mode.
        return h

    def kernel(mol_ref, pro_ref, *refs):
        o_ref = refs[-1]
        prefs = refs[:-1]

        w1m_ref, w1p_ref, p0_ref = prefs[0], prefs[1], prefs[2]
        # First Linear with the concat fused away:
        #   [mol, pro] @ W1 == mol @ W1[:Dm] + pro @ W1[Dm:]
        h = (jnp.dot(mol_ref[...], w1m_ref[...], preferred_element_type=jnp.float32)
             + jnp.dot(pro_ref[...], w1p_ref[...], preferred_element_type=jnp.float32))
        h = _bias_act_norm(h, p0_ref)

        idx = 3
        for _ in range(n_hidden_layers - 1):
            w_ref, p_ref = prefs[idx], prefs[idx + 1]
            idx += 2
            hh = jnp.dot(h.astype(w_ref.dtype), w_ref[...],
                         preferred_element_type=jnp.float32)
            h = _bias_act_norm(hh, p_ref)

        pf_ref = prefs[idx]
        wf = pf_ref[0:1, :]      # (1, n_inner)
        bf = pf_ref[1:2, 0:1]    # (1, 1)
        # Final n_inner -> 1 projection, emitted lane-dense as a (1, tile_b) row:
        #   out[0, b] = sum_d wf[0, d] * h[b, d]      (batch ends up on the lane axis)
        out_row = jnp.einsum("kd,nd->kn", wf, h,
                             preferred_element_type=jnp.float32) + bf
        o_ref[...] = out_row.astype(o_ref.dtype)

    return kernel


def init_params(key, esm_dim, mol_dim, n_inner, N, dtype=jnp.float32):
    """PyTorch nn.Linear-style init (U(-1/sqrt(fan_in), +)), packed for the kernel.

    Returns a flat list:
      [W1_mol (mol_dim, n_inner), W1_pro (esm_dim, n_inner), P0 (3, n_inner),
       (W_i (n_inner, n_inner), P_i (3, n_inner)) * (N - 1),
       Pf (2, n_inner)]
    with P = stack([bias, gamma, beta]) and Pf = [final weight row; final bias at [1, 0]].
    """
    params = []
    in_dim = mol_dim + esm_dim            # concat order is [mol, pro]
    dims = [in_dim] + [n_inner] * N
    for i in range(N):
        key, kw, kb = jax.random.split(key, 3)
        bound = 1.0 / math.sqrt(dims[i])
        W = jax.random.uniform(kw, (dims[i], dims[i + 1]), dtype, -bound, bound)
        b = jax.random.uniform(kb, (1, dims[i + 1]), dtype, -bound, bound)
        gamma = jnp.ones((1, dims[i + 1]), dtype)
        beta = jnp.zeros((1, dims[i + 1]), dtype)
        P = jnp.concatenate([b, gamma, beta], axis=0)        # (3, n_inner)
        if i == 0:
            params += [W[:mol_dim], W[mol_dim:], P]           # split at the concat boundary
        else:
            params += [W, P]
    key, kw, kb = jax.random.split(key, 3)
    bound = 1.0 / math.sqrt(n_inner)
    wf = jax.random.uniform(kw, (1, n_inner), dtype, -bound, bound)
    bf = jax.random.uniform(kb, (1, 1), dtype, -bound, bound)
    bf_row = jnp.zeros((1, n_inner), dtype).at[0, 0].set(bf[0, 0])
    params.append(jnp.concatenate([wf, bf_row], axis=0))      # (2, n_inner)
    return params


@functools.partial(jax.jit, static_argnames=("n_hidden_layers", "tile_b"))
def _embed_mlp_pallas(mol, pro, params, n_hidden_layers, tile_b):
    b_pad, Dm = mol.shape
    _, Dp = pro.shape

    kernel = _make_mlp_kernel(n_hidden_layers)
    grid = (b_pad // tile_b,)   # batch already padded to a multiple of tile_b

    in_specs = [
        pl.BlockSpec((tile_b, Dm), lambda i: (i, 0)),
        pl.BlockSpec((tile_b, Dp), lambda i: (i, 0)),
    ]
    # Parameters are tiny (< a few KiB total): full blocks, resident in VMEM.
    for p in params:
        in_specs.append(pl.BlockSpec(p.shape, lambda i: (0, 0)))
    # Lane-dense output: one (1, tile_b) row per grid step (unmasked stores).
    out_specs = pl.BlockSpec((1, tile_b), lambda i: (0, i))

    return pl.pallas_call(
        kernel,
        out_shape=jax.ShapeDtypeStruct((1, b_pad), jnp.float32),
        grid_spec=pltpu.PrefetchScalarGridSpec(
            num_scalar_prefetch=0,
            grid=grid,
            in_specs=in_specs,
            out_specs=out_specs,
        ),
        compiler_params=pltpu.CompilerParams(
            dimension_semantics=("parallel",)),   # batch tiles are independent (megacore-shardable)
    )(mol, pro, *params)


def embed_mlp_forward(mol_feat, pro_feat, mol_embed, pro_embed, params, N,
                      tile_b=256, compute_dtype=jnp.float32):
    """Matches Embed_mlp.forward (eval mode). mol_feat / pro_feat are unused, as in the module."""
    del mol_feat, pro_feat
    if mol_embed.ndim == 3:
        mol_embed = mol_embed.reshape((mol_embed.shape[0], -1))
        pro_embed = pro_embed.reshape((pro_embed.shape[0], -1))
    B = mol_embed.shape[0]

    # Tile sizing: multiple of 128 so the lane-dense output block is unmasked,
    # but never larger than the (8-rounded) batch (keeps tiny demos cheap).
    tile_b = max(128, -(-int(tile_b) // 128) * 128)
    tile_b = min(tile_b, -(-B // 8) * 8)
    b_pad = -(-B // tile_b) * tile_b

    mol = mol_embed.astype(compute_dtype)
    pro = pro_embed.astype(compute_dtype)
    if b_pad != B:
        mol = jnp.pad(mol, ((0, b_pad - B), (0, 0)))
        pro = jnp.pad(pro, ((0, b_pad - B), (0, 0)))

    # Weight matrices stream at compute_dtype; bias/LayerNorm/final params stay f32.
    params = list(params)
    params[0] = params[0].astype(compute_dtype)
    params[1] = params[1].astype(compute_dtype)
    for i in range(N - 1):
        params[3 + 2 * i] = params[3 + 2 * i].astype(compute_dtype)

    out_row = _embed_mlp_pallas(mol, pro, tuple(params),
                                n_hidden_layers=N, tile_b=tile_b)   # (1, b_pad)
    return out_row[0, :B][:, None]                                   # (B, 1)


def _reference_forward(mol_embed, pro_embed, params, N):
    """Plain-JAX reference mirroring the PyTorch module (eval mode)."""
    if mol_embed.ndim == 3:
        mol_embed = mol_embed.reshape((mol_embed.shape[0], -1))
        pro_embed = pro_embed.reshape((pro_embed.shape[0], -1))
    x = jnp.concatenate([mol_embed, pro_embed], axis=-1).astype(jnp.float32)
    W1 = jnp.concatenate([params[0], params[1]], axis=0)
    h = x @ W1
    idx = 2
    for layer in range(N):
        if layer > 0:
            W = params[idx]; idx += 1
            h = h @ W
        P = params[idx]; idx += 1
        b, g, be = P[0:1], P[1:2], P[2:3]
        h = h + b
        h = jnp.where(h >= 0, h, 0.01 * h)
        mu = jnp.mean(h, -1, keepdims=True)
        var = jnp.mean((h - mu) ** 2, -1, keepdims=True)
        h = (h - mu) / jnp.sqrt(var + 1e-5) * g + be
    Pf = params[idx]
    wf = Pf[0:1]
    bf = Pf[1, 0]
    return h @ wf.T + bf


if __name__ == "__main__":
    # config: esm_dim=48, mol_dim=16, n_inner=32, N=2, norm='LayerNorm'
    esm_dim, mol_dim, n_inner, N = 48, 16, 32, 2
    B = 16

    key = jax.random.PRNGKey(0)
    k_mf, k_pf, k_me, k_pe, k_params = jax.random.split(key, 5)

    mol_feat = jax.random.normal(k_mf, (B, 8), jnp.float32)      # unused by forward
    pro_feat = jax.random.normal(k_pf, (B, 8), jnp.float32)      # unused by forward
    mol_embed = jax.random.normal(k_me, (B, 4, 4), jnp.float32)  # -> (B, 16) = mol_dim
    pro_embed = jax.random.normal(k_pe, (B, 6, 8), jnp.float32)  # -> (B, 48) = esm_dim

    params = init_params(k_params, esm_dim, mol_dim, n_inner, N)

    out = embed_mlp_forward(mol_feat, pro_feat, mol_embed, pro_embed, params, N)
    out = jax.block_until_ready(out)

    ref = _reference_forward(mol_embed, pro_embed, params, N)
    assert out.shape == (B, 1), out.shape
    max_err = float(jnp.max(jnp.abs(out - ref)))
    assert jnp.allclose(out, ref, atol=5e-4, rtol=5e-4), max_err

    print("KERNEL_OK")
</pallas_src>

<mosaic_0001>
module attributes {stable_mosaic.version = 11 : i64} {
  func.func @kernel(%arg0: i32, %arg1: memref<16x16xf32, #tpu.memory_space<vmem>>, %arg2: memref<16x48xf32, #tpu.memory_space<vmem>>, %arg3: memref<16x32xf32, #tpu.memory_space<vmem>>, %arg4: memref<48x32xf32, #tpu.memory_space<vmem>>, %arg5: memref<3x32xf32, #tpu.memory_space<vmem>>, %arg6: memref<32x32xf32, #tpu.memory_space<vmem>>, %arg7: memref<3x32xf32, #tpu.memory_space<vmem>>, %arg8: memref<2x32xf32, #tpu.memory_space<vmem>>, %arg9: memref<1x16xf32, #tpu.memory_space<vmem>>) attributes {dimension_semantics = [#tpu.dimension_semantics<parallel>], iteration_bounds = array<i64: 1>, scalar_prefetch = 0 : i64, scratch_operands = 0 : i64, tpu.core_type = #tpu.core_type<tc>, window_params = [{transform_indices = @transform_0, window_bounds = array<i64: 16, 16>}, {transform_indices = @transform_1, window_bounds = array<i64: 16, 48>}, {pipeline_mode = #tpu.pipeline_mode<synchronous>, transform_indices = @transform_2, window_bounds = array<i64: 16, 32>}, {pipeline_mode = #tpu.pipeline_mode<synchronous>, transform_indices = @transform_3, window_bounds = array<i64: 48, 32>}, {pipeline_mode = #tpu.pipeline_mode<synchronous>, transform_indices = @transform_4, window_bounds = array<i64: 3, 32>}, {pipeline_mode = #tpu.pipeline_mode<synchronous>, transform_indices = @transform_5, window_bounds = array<i64: 32, 32>}, {pipeline_mode = #tpu.pipeline_mode<synchronous>, transform_indices = @transform_6, window_bounds = array<i64: 3, 32>}, {pipeline_mode = #tpu.pipeline_mode<synchronous>, transform_indices = @transform_7, window_bounds = array<i64: 2, 32>}, {transform_indices = @transform_8, window_bounds = array<i64: 1, 16>}]} {
    %c0 = arith.constant 0 : index
    %c0_0 = arith.constant 0 : index
    %0 = vector.load %arg1[%c0, %c0_0] : memref<16x16xf32, #tpu.memory_space<vmem>>, vector<16x16xf32>
    %c0_1 = arith.constant 0 : index
    %c0_2 = arith.constant 0 : index
    %1 = vector.load %arg3[%c0_1, %c0_2] : memref<16x32xf32, #tpu.memory_space<vmem>>, vector<16x32xf32>
    %cst = arith.constant dense<0.000000e+00> : vector<16x32xf32>
    %2 = tpu.matmul %0, %1, %cst {dimension_numbers = #tpu.dot_dimension_numbers<[1], [0], [0], [1], [0, 0, 1, 1], [], []>} : vector<16x16xf32>, vector<16x32xf32>, vector<16x32xf32> -> vector<16x32xf32>
    %c0_3 = arith.constant 0 : index
    %c0_4 = arith.constant 0 : index
    %3 = vector.load %arg2[%c0_3, %c0_4] : memref<16x48xf32, #tpu.memory_space<vmem>>, vector<16x48xf32>
    %c0_5 = arith.constant 0 : index
    %c0_6 = arith.constant 0 : index
    %4 = vector.load %arg4[%c0_5, %c0_6] : memref<48x32xf32, #tpu.memory_space<vmem>>, vector<48x32xf32>
    %cst_7 = arith.constant dense<0.000000e+00> : vector<16x32xf32>
    %5 = tpu.matmul %3, %4, %cst_7 {dimension_numbers = #tpu.dot_dimension_numbers<[1], [0], [0], [1], [0, 0, 1, 1], [], []>} : vector<16x48xf32>, vector<48x32xf32>, vector<16x32xf32> -> vector<16x32xf32>
    %6 = arith.addf %2, %5 : vector<16x32xf32>
    %c0_8 = arith.constant 0 : index
    %c0_9 = arith.constant 0 : index
    %7 = vector.load %arg5[%c0_8, %c0_9] : memref<3x32xf32, #tpu.memory_space<vmem>>, vector<1x32xf32>
    %c1 = arith.constant 1 : index
    %c0_10 = arith.constant 0 : index
    %8 = vector.load %arg5[%c1, %c0_10] : memref<3x32xf32, #tpu.memory_space<vmem>>, vector<1x32xf32>
    %c2 = arith.constant 2 : index
    %c0_11 = arith.constant 0 : index
    %9 = vector.load %arg5[%c2, %c0_11] : memref<3x32xf32, #tpu.memory_space<vmem>>, vector<1x32xf32>
    %10 = vector.broadcast %7 : vector<1x32xf32> to vector<16x32xf32>
    %11 = arith.addf %6, %10 : vector<16x32xf32>
    %cst_12 = arith.constant 0.000000e+00 : f32
    %12 = vector.broadcast %cst_12 : f32 to vector<16x32xf32>
    %13 = arith.cmpf oge, %11, %12 : vector<16x32xf32>
    %cst_13 = arith.constant 0.00999999977 : f32
    %14 = vector.broadcast %cst_13 : f32 to vector<16x32xf32>
    %15 = arith.mulf %14, %11 : vector<16x32xf32>
    %16 = arith.select %13, %11, %15 : vector<16x32xi1>, vector<16x32xf32>
    %cst_14 = arith.constant dense<0.000000e+00> : vector<16xf32>
    %17 = vector.multi_reduction <add>, %16, %cst_14 [1] : vector<16x32xf32> to vector<16xf32>
    %18 = vector.shape_cast %17 : vector<16xf32> to vector<16x1xf32>
    %19 = arith.mulf %16, %16 : vector<16x32xf32>
    %cst_15 = arith.constant dense<0.000000e+00> : vector<16xf32>
    %20 = vector.multi_reduction <add>, %19, %cst_15 [1] : vector<16x32xf32> to vector<16xf32>
    %21 = vector.shape_cast %20 : vector<16xf32> to vector<16x1xf32>
    %cst_16 = arith.constant 3.125000e-02 : f32
    %22 = vector.broadcast %cst_16 : f32 to vector<16x1xf32>
    %23 = arith.mulf %18, %22 : vector<16x1xf32>
    %cst_17 = arith.constant 3.125000e-02 : f32
    %24 = vector.broadcast %cst_17 : f32 to vector<16x1xf32>
    %25 = arith.mulf %21, %24 : vector<16x1xf32>
    %26 = arith.mulf %23, %23 : vector<16x1xf32>
    %27 = arith.subf %25, %26 : vector<16x1xf32>
    %cst_18 = arith.constant 0.000000e+00 : f32
    %28 = vector.broadcast %cst_18 : f32 to vector<16x1xf32>
    %29 = arith.maximumf %27, %28 : vector<16x1xf32>
    %30 = vector.broadcast %23 : vector<16x1xf32> to vector<16x32xf32>
    %31 = arith.subf %16, %30 : vector<16x32xf32>
    %cst_19 = arith.constant 9.99999974E-6 : f32
    %32 = vector.broadcast %cst_19 : f32 to vector<16x1xf32>
    %33 = arith.addf %29, %32 : vector<16x1xf32>
    %34 = math.rsqrt %33 : vector<16x1xf32>
    %35 = vector.broadcast %34 : vector<16x1xf32> to vector<16x32xf32>
    %36 = arith.mulf %31, %35 : vector<16x32xf32>
    %37 = vector.broadcast %8 : vector<1x32xf32> to vector<16x32xf32>
    %38 = arith.mulf %36, %37 : vector<16x32xf32>
    %39 = vector.broadcast %9 : vector<1x32xf32> to vector<16x32xf32>
    %40 = arith.addf %38, %39 : vector<16x32xf32>
    %c0_20 = arith.constant 0 : index
    %c0_21 = arith.constant 0 : index
    %41 = vector.load %arg6[%c0_20, %c0_21] : memref<32x32xf32, #tpu.memory_space<vmem>>, vector<32x32xf32>
    %cst_22 = arith.constant dense<0.000000e+00> : vector<16x32xf32>
    %42 = tpu.matmul %40, %41, %cst_22 {dimension_numbers = #tpu.dot_dimension_numbers<[1], [0], [0], [1], [0, 0, 1, 1], [], []>} : vector<16x32xf32>, vector<32x32xf32>, vector<16x32xf32> -> vector<16x32xf32>
    %c0_23 = arith.constant 0 : index
    %c0_24 = arith.constant 0 : index
    %43 = vector.load %arg7[%c0_23, %c0_24] : memref<3x32xf32, #tpu.memory_space<vmem>>, vector<1x32xf32>
    %c1_25 = arith.constant 1 : index
    %c0_26 = arith.constant 0 : index
    %44 = vector.load %arg7[%c1_25, %c0_26] : memref<3x32xf32, #tpu.memory_space<vmem>>, vector<1x32xf32>
    %c2_27 = arith.constant 2 : index
    %c0_28 = arith.constant 0 : index
    %45 = vector.load %arg7[%c2_27, %c0_28] : memref<3x32xf32, #tpu.memory_space<vmem>>, vector<1x32xf32>
    %46 = vector.broadcast %43 : vector<1x32xf32> to vector<16x32xf32>
    %47 = arith.addf %42, %46 : vector<16x32xf32>
    %cst_29 = arith.constant 0.000000e+00 : f32
    %48 = vector.broadcast %cst_29 : f32 to vector<16x32xf32>
    %49 = arith.cmpf oge, %47, %48 : vector<16x32xf32>
    %cst_30 = arith.constant 0.00999999977 : f32
    %50 = vector.broadcast %cst_30 : f32 to vector<16x32xf32>
    %51 = arith.mulf %50, %47 : vector<16x32xf32>
    %52 = arith.select %49, %47, %51 : vector<16x32xi1>, vector<16x32xf32>
    %cst_31 = arith.constant dense<0.000000e+00> : vector<16xf32>
    %53 = vector.multi_reduction <add>, %52, %cst_31 [1] : vector<16x32xf32> to vector<16xf32>
    %54 = vector.shape_cast %53 : vector<16xf32> to vector<16x1xf32>
    %55 = arith.mulf %52, %52 : vector<16x32xf32>
    %cst_32 = arith.constant dense<0.000000e+00> : vector<16xf32>
    %56 = vector.multi_reduction <add>, %55, %cst_32 [1] : vector<16x32xf32> to vector<16xf32>
    %57 = vector.shape_cast %56 : vector<16xf32> to vector<16x1xf32>
    %cst_33 = arith.constant 3.125000e-02 : f32
    %58 = vector.broadcast %cst_33 : f32 to vector<16x1xf32>
    %59 = arith.mulf %54, %58 : vector<16x1xf32>
    %cst_34 = arith.constant 3.125000e-02 : f32
    %60 = vector.broadcast %cst_34 : f32 to vector<16x1xf32>
    %61 = arith.mulf %57, %60 : vector<16x1xf32>
    %62 = arith.mulf %59, %59 : vector<16x1xf32>
    %63 = arith.subf %61, %62 : vector<16x1xf32>
    %cst_35 = arith.constant 0.000000e+00 : f32
    %64 = vector.broadcast %cst_35 : f32 to vector<16x1xf32>
    %65 = arith.maximumf %63, %64 : vector<16x1xf32>
    %66 = vector.broadcast %59 : vector<16x1xf32> to vector<16x32xf32>
    %67 = arith.subf %52, %66 : vector<16x32xf32>
    %cst_36 = arith.constant 9.99999974E-6 : f32
    %68 = vector.broadcast %cst_36 : f32 to vector<16x1xf32>
    %69 = arith.addf %65, %68 : vector<16x1xf32>
    %70 = math.rsqrt %69 : vector<16x1xf32>
    %71 = vector.broadcast %70 : vector<16x1xf32> to vector<16x32xf32>
    %72 = arith.mulf %67, %71 : vector<16x32xf32>
    %73 = vector.broadcast %44 : vector<1x32xf32> to vector<16x32xf32>
    %74 = arith.mulf %72, %73 : vector<16x32xf32>
    %75 = vector.broadcast %45 : vector<1x32xf32> to vector<16x32xf32>
    %76 = arith.addf %74, %75 : vector<16x32xf32>
    %c0_37 = arith.constant 0 : index
    %c0_38 = arith.constant 0 : index
    %77 = vector.load %arg8[%c0_37, %c0_38] : memref<2x32xf32, #tpu.memory_space<vmem>>, vector<1x32xf32>
    %c1_39 = arith.constant 1 : index
    %c0_40 = arith.constant 0 : index
    %78 = vector.load %arg8[%c1_39, %c0_40] : memref<2x32xf32, #tpu.memory_space<vmem>>, vector<1x1xf32>
    "tpu.trace_start"() <{level = 10 : i32, message = "kd,nd->kn"}> : () -> ()
    %cst_41 = arith.constant dense<0.000000e+00> : vector<1x16xf32>
    %79 = tpu.matmul %77, %76, %cst_41 {dimension_numbers = #tpu.dot_dimension_numbers<[1], [1], [0], [0], [0, 0, 1, 0], [], []>} : vector<1x32xf32>, vector<16x32xf32>, vector<1x16xf32> -> vector<1x16xf32>
    "tpu.trace_stop"() : () -> ()
    %80 = vector.broadcast %78 : vector<1x1xf32> to vector<1x16xf32>
    %81 = arith.addf %79, %80 : vector<1x16xf32>
    %c0_42 = arith.constant 0 : index
    %c0_43 = arith.constant 0 : index
    %82 = vector.load %arg9[%c0_42, %c0_43] : memref<1x16xf32, #tpu.memory_space<vmem>>, vector<1x16xf32>
    tpu.vector_store %arg9[%c0_42, %c0_43], %81 {strides = array<i32>} : memref<1x16xf32, #tpu.memory_space<vmem>>, vector<1x16xf32>,
    return
  }
  func.func @transform_0(%arg0: i32) -> (i32, i32) {
    %c0_i32 = arith.constant 0 : i32
    %c0_i32_0 = arith.constant 0 : i32
    return %arg0, %c0_i32 : i32, i32
  }
  func.func @transform_1(%arg0: i32) -> (i32, i32) {
    %c0_i32 = arith.constant 0 : i32
    %c0_i32_0 = arith.constant 0 : i32
    return %arg0, %c0_i32 : i32, i32
  }
  func.func @transform_2(%arg0: i32) -> (i32, i32) {
    %c0_i32 = arith.constant 0 : i32
    %c0_i32_0 = arith.constant 0 : i32
    %c0_i32_1 = arith.constant 0 : i32
    return %c0_i32, %c0_i32_0 : i32, i32
  }
  func.func @transform_3(%arg0: i32) -> (i32, i32) {
    %c0_i32 = arith.constant 0 : i32
    %c0_i32_0 = arith.constant 0 : i32
    %c0_i32_1 = arith.constant 0 : i32
    return %c0_i32, %c0_i32_0 : i32, i32
  }
  func.func @transform_4(%arg0: i32) -> (i32, i32) {
    %c0_i32 = arith.constant 0 : i32
    %c0_i32_0 = arith.constant 0 : i32
    %c0_i32_1 = arith.constant 0 : i32
    return %c0_i32, %c0_i32_0 : i32, i32
  }
  func.func @transform_5(%arg0: i32) -> (i32, i32) {
    %c0_i32 = arith.constant 0 : i32
    %c0_i32_0 = arith.constant 0 : i32
    %c0_i32_1 = arith.constant 0 : i32
    return %c0_i32, %c0_i32_0 : i32, i32
  }
  func.func @transform_6(%arg0: i32) -> (i32, i32) {
    %c0_i32 = arith.constant 0 : i32
    %c0_i32_0 = arith.constant 0 : i32
    %c0_i32_1 = arith.constant 0 : i32
    return %c0_i32, %c0_i32_0 : i32, i32
  }
  func.func @transform_7(%arg0: i32) -> (i32, i32) {
    %c0_i32 = arith.constant 0 : i32
    %c0_i32_0 = arith.constant 0 : i32
    %c0_i32_1 = arith.constant 0 : i32
    return %c0_i32, %c0_i32_0 : i32, i32
  }
  func.func @transform_8(%arg0: i32) -> (i32, i32) {
    %c0_i32 = arith.constant 0 : i32
    %c0_i32_0 = arith.constant 0 : i32
    return %c0_i32, %arg0 : i32, i32
  }
}

</mosaic_0001>

<bundles_post_ra>
// kernel: _embed_mlp_pallas.1
= control target key start
LH: loop header
LB: loop body
LE: loop exit
PB: predicated region body
PF: predicated region fallthrough
CT: control target
= control target key end

     0   :  { %vm42_vm0 = vcmask 392192   ;;  %s803_s0 = inlined_call_operand.vmem [shape: f32[16,16], index: 0, kind: input, shape index: {}]   ;;  %s804_s1 = inlined_call_operand.vmem [shape: f32[16,48], index: 1, kind: input, shape index: {}]   ;;  %s805_s2 = inlined_call_operand.vmem [shape: f32[16,32], index: 2, kind: input, shape index: {}]   ;;  %s806_s3 = inlined_call_operand.vmem [shape: f32[48,32], index: 3, kind: input, shape index: {}]   ;;  %s807_s4 = inlined_call_operand.vmem [shape: f32[3,32], index: 4, kind: input, shape index: {}]   ;;  %s808_s5 = inlined_call_operand.vmem [shape: f32[32,32], index: 5, kind: input, shape index: {}]   ;;  %s809_s6 = inlined_call_operand.vmem [shape: f32[3,32], index: 6, kind: input, shape index: {}]   ;;  %s810_s7 = inlined_call_operand.vmem [shape: f32[2,32], index: 7, kind: input, shape index: {}]   ;;  %s811_s8 = inlined_call_operand.hbm [shape: f32[1,16], index: 8, kind: output, shape index: {}]  }
   0x1   :  { %v36_v0 = vld [vmem:[%s806_s3] sm:$0xff]  ;;  %v37_v1 = vld [vmem:[%s806_s3 + $0x8] sm:$0xff]  ;;  %v38_v2 = vld [vmem:[%s806_s3 + $0x10] sm:$0xff] }
   0x2   :  { %v586_v3 = vpack.c.bf16 %v37_v1, %v36_v0  ;;  %v39_v4 = vld [vmem:[%s806_s3 + $0x18] sm:$0xff]  ;;  %v40_v6 = vld [vmem:[%s806_s3 + $0x20] sm:$0xff]  ;;  %v41_v7 = vld [vmem:[%s806_s3 + $0x28] sm:$0xff] }
   0x3   :  { %v590_v5 = vpack.c.bf16 %v39_v4, %v38_v2  ;;  %v34_v8 = vld [vmem:[%s804_s1] sm:$0xff] }
   0x4   :  { %587 = vmatprep.subr.bf16.mxu0 %v586_v3  ;;  %558 = vmatprep.mubr.msk.f32.mxu0 %vm42_vm0, %v34_v8 }
   0x5   :  { %589 = vmatpush3.bf16.msra.mxu0 %v586_v3 }
   0x6   :  { %13 = vsyncpa [#allocation3], 0  ;;  %591 = vmatprep.subr.bf16.mxu0 %v590_v5  ;;  %v594_v9 = vpack.c.bf16 %v41_v7, %v40_v6  ;;  %v32_v10 = vld [vmem:[%s805_s2] sm:$0xff]  ;;  %v33_v11 = vld [vmem:[%s805_s2 + $0x8] sm:$0xff]  ;;  %vm124_vm1 = vcmask 130048   ;;  %vm221_vm4 = vcmask 261120  }
   0x7   :  { %v598_v12 = vpack.c.bf16 %v33_v11, %v32_v10  ;;  %v35_v13 = vld [vmem:[%s804_s1 + $0x8] sm:$0xff]  ;;  %v30_v14 = vld [vmem:[%s803_s0] sm:$0xff]  ;;  %v268_v33 = vld [vmem:[%s808_s5 + $0x10] sm:$0xff]  ;;  %vm655_vm7 = vmmov 0   ;;  %s658_s24 = smov [#allocation2]   ;;  %vm494_vm9 = vcmask 122880  }
   0x8   :  { %v31_v15 = vld [vmem:[%s803_s0 + $0x8] sm:$0xff]  ;;  %v514_v16 = vld [vmem:[%s807_s4] ss:$0 sm:$0xff]  ;;  %v269_v35 = vld [vmem:[%s808_s5 + $0x18] sm:$0xff]  ;;  %s502_s25 = sshll.u32 %s658_s24, 4  ;;  %s503_s25 = int_to_ptr.vmem [resolvable:$true] %s502_s25 }
   0x9   :  { %593 = vmatpush3.bf16.msra.mxu0 %v590_v5  ;;  %v266_v31 = vld [vmem:[%s808_s5] sm:$0xff]  ;;  %v267_v32 = vld [vmem:[%s808_s5 + $0x8] sm:$0xff]  ;;  %v606_v36 = vpack.c.bf16 %v269_v35, %v268_v33  ;;  %vm612_vm8 = vmpackc.low %vm221_vm4, %vm221_vm4  ;;  %s634_s26 = scalar_lea.vmem %s503_s25, 32  ;;  %p635_p1 = scmp.lt.s32.totalorder %s503_s25, %s503_s25 }
   0xa   :  { %595 = vmatprep.subr.bf16.mxu0 %v594_v9  ;;  %v602_v34 = vpack.c.bf16 %v267_v32, %v266_v31  ;;  %v515_v55 = vld [vmem:[%s807_s4 + $0x1] ss:$0 sm:$0xff]  ;;  %v516_v57 = vld [vmem:[%s807_s4 + $0x2] ss:$0 sm:$0xff]  ;;  %v517_v1 = vld [vmem:[%s809_s6] ss:$0 sm:$0xff] }
   0xc   :  { %603 = vmatprep.subr.bf16.mxu1 %v602_v34 }
   0xd   :  { %597 = vmatpush3.bf16.msra.mxu0 %v594_v9  ;;  %605 = vmatpush3.bf16.msra.mxu1 %v602_v34 }
   0xe   :  { %599 = vmatprep.subr.bf16.mxu0 %v598_v12  ;;  %607 = vmatprep.subr.bf16.mxu1 %v606_v36 }
  0x10   :  { %559 = vmatmul.mubr.msk.f32.vlgmr.msra.gmra.mrb[0].mxu0 %vm42_vm0, %v35_v13 }
  0x11   :  { %601 = vmatpush3.bf16.msra.mxu0 %v598_v12  ;;  %565 = vmatprep.mubr.msk.f32.mxu0 %vm124_vm1, %v30_v14 }
  0x12   :  { %609 = vmatpush3.bf16.msra.mxu1 %v606_v36 }
  0x18   :  { %566 = vmatmul.mubr.msk.f32.vlgmr.msra.gmra.mrb[0].mxu0 %vm124_vm1, %v31_v15 }
  0xeb   :  { %v567_v17 = vpop.f32.mrb[0].mxu0 }
  0xec   :  { %v214_v18 = vadd.f32 %v567_v17, %v514_v16  ;;  %v197_v19 = vpop.f32.mrb[1].mxu0  ;;  %v656_v17 = vmov 0.0  }
  0xed   :  { %v213_v20 = vadd.f32 %v514_v16, %v197_v19  ;;  %v654_v16 = vmov 0.0|0.0   ;;  %v657_v19 = vmov 0  }
  0xee   :  { %v218_v21 = vmul.f32 0.01, %v214_v18  ;;  %vm216_vm2 = vcmp.ge.f32.partialorder %v214_v18, 0.0  ;;  %610 = vmatprep.subr.bf16.mxu1 %v654_v16  ;;  %621 = vset.pattern.permute.xlu0 %v657_v19 }
  0xef   :  { %v217_v22 = vmul.f32 0.01, %v213_v20  ;;  %vm215_vm3 = vcmp.ge.f32.partialorder %v213_v20, 0.0 }
  0xf0   :  { %v220_v24 = vsel %vm216_vm2, %v214_v18, %v218_v21  ;;  %v409_v18 = vld [vmem:[%s810_s7 + $0x1] sm:$0x1] }
  0xf1   :  { %v219_v23 = vsel %vm215_vm3, %v213_v20, %v217_v22  ;;  %v229_v28 = vmul.f32 %v220_v24, %v220_v24  ;;  %v225_v29 = vsel %vm221_vm4, %v220_v24, 0.0 }
  0xf2   :  { %v222_v25 = vsel %vm221_vm4, %v219_v23, 0.0  ;;  %v228_v26 = vmul.f32 %v219_v23, %v219_v23 }
  0xf3   :  { %223 = vadd.xlane.f32.xlu0 %v222_v25  ;;  %v233_v30 = vsel %vm221_vm4, %v229_v28, 0.0 }
  0xf4   :  { %v230_v27 = vsel %vm221_vm4, %v228_v26, 0.0 }
  0xf5   :  { %231 = vadd.xlane.f32.xlu1 %v230_v27 }
  0xf7   :  { %226 = vadd.xlane.f32.xlu0 %v225_v29 }
  0xf9   :  { %234 = vadd.xlane.f32.xlu1 %v233_v30 }
 0x180   :  { %v224_v37 = vpop.xlane.xlu0 %223 }
 0x181   :  { %v236_v38 = vmul.f32 0.03125, %v224_v37 }
 0x182   :  { %v232_v39 = vpop.xlane.xlu1 %231 }
 0x183   :  { %v240_v40 = vmul.f32 %v236_v38, %v236_v38  ;;  %v238_v41 = vmul.f32 0.03125, %v232_v39  ;;  %v246_v53 = vsub.f32 %v219_v23, %v236_v38  ;;  %v520_v39 = vld [vmem:[%s809_s6 + $0x1] ss:$0 sm:$0xff] }
 0x184   :  { %v227_v42 = vpop.xlane.xlu0 %226 }
 0x185   :  { %v242_v43 = vsub.f32 %v238_v41, %v240_v40  ;;  %v237_v44 = vmul.f32 0.03125, %v227_v42 }
 0x186   :  { %v235_v45 = vpop.xlane.xlu1 %234 }
 0x187   :  { %v244_v46 = vmax.f32 %v242_v43, 0.0  ;;  %v241_v47 = vmul.f32 %v237_v44, %v237_v44  ;;  %v239_v48 = vmul.f32 0.03125, %v235_v45  ;;  %v247_v58 = vsub.f32 %v220_v24, %v237_v44  ;;  %v521_v43 = vld [vmem:[%s809_s6 + $0x2] ss:$0 sm:$0xff]  ;;  %s630_s6 = scalar_lea.vmem %s503_s25, 16 }
 0x188   :  { %p631_p0 = scmp.ne.s32.totalorder %s503_s25, %s630_s6  ;;  %p636_p2 = scmp.lt.s32.totalorder %s634_s26, %s630_s6 }
 0x189   :  { %v248_v49 = vadd.f32 1e-05, %v244_v46  ;;  %v243_v50 = vsub.f32 %v239_v48, %v241_v47 }
 0x18a   :  { %p637_p3 = por %p636_p2, %p635_p1 }
 0x18b   :  { %622 = vrsqrt.f32 %v248_v49  ;;  %v245_v51 = vmax.f32 %v243_v50, 0.0  ;;  %v408_v49 = vld [vmem:[%s810_s7] sm:$0x1] }
 0x18c   :  { %p638_p4 = pnand %p637_p3, %p631_p0 }
 0x18d   :  { %v249_v52 = vadd.f32 1e-05, %v245_v51 }
 0x18f   :  { %624 = vrsqrt.f32 %v249_v52 }
 0x195   :  { %v623_v54 = vpop.eup %622 }
 0x196   :  { %v252_v56 = vmul.f32 %v623_v54, %v246_v53 }
 0x198   :  { %v258_v59 = vmul.f32 %v515_v55, %v252_v56 }
 0x199   :  { %v625_v60 = vpop.eup %624 }
 0x19a   :  { %v253_v61 = vmul.f32 %v625_v60, %v247_v58  ;;  %v264_v62 = vadd.f32 %v516_v57, %v258_v59 }
 0x19c   :  { %v259_v63 = vmul.f32 %v515_v55, %v253_v61  ;;  %576 = vmatprep.mubr.msk.f32.mxu1 %vm221_vm4, %v264_v62 }
 0x19e   :  { %v265_v0 = vadd.f32 %v516_v57, %v259_v63 }
 0x1a0   :  { %577 = vmatmul.mubr.msk.f32.vlgmr.msra.gmra.mrb[0].mxu1 %vm221_vm4, %v265_v0 }
 0x1a1   :  { %583 = vmatprep.mubr.msk.f32.mxu1 %vm655_vm7, %v656_v17 }
 0x273   :  { %v578_v2 = vpop.f32.mrb[0].mxu1 }
 0x274   :  { %v355_v3 = vadd.f32 %v578_v2, %v517_v1  ;;  %v349_v4 = vpop.f32.mrb[1].mxu1 }
 0x275   :  { %v350_v5 = vadd.f32 %v517_v1, %v349_v4 }
 0x276   :  { %v361_v6 = vmul.f32 0.01, %v355_v3  ;;  %vm359_vm5 = vcmp.ge.f32.partialorder %v355_v3, 0.0 }
 0x277   :  { %v360_v7 = vmul.f32 0.01, %v350_v5  ;;  %vm358_vm6 = vcmp.ge.f32.partialorder %v350_v5, 0.0 }
 0x278   :  { %v363_v8 = vsel %vm359_vm5, %v355_v3, %v361_v6 }
 0x279   :  { %v367_v9 = vsel %vm221_vm4, %v363_v8, 0.0  ;;  %v362_v10 = vsel %vm358_vm6, %v350_v5, %v360_v7  ;;  %v371_v11 = vmul.f32 %v363_v8, %v363_v8 }
 0x27a   :  { %368 = vadd.xlane.f32.xlu1 %v367_v9  ;;  %v364_v12 = vsel %vm221_vm4, %v362_v10, 0.0  ;;  %v370_v13 = vmul.f32 %v362_v10, %v362_v10 }
 0x27b   :  { %365 = vadd.xlane.f32.xlu0 %v364_v12  ;;  %v375_v14 = vsel %vm221_vm4, %v371_v11, 0.0 }
 0x27c   :  { %v372_v15 = vsel %vm221_vm4, %v370_v13, 0.0 }
 0x27e   :  { %376 = vadd.xlane.f32.xlu1 %v375_v14 }
 0x27f   :  { %373 = vadd.xlane.f32.xlu0 %v372_v15 }
 0x295   :  { %412 = vperm.xlu0 %621, %v409_v18  }
 0x307   :  { %v369_v20 = vpop.xlane.xlu1 %368 }
 0x308   :  { %v379_v21 = vmul.f32 0.03125, %v369_v20  ;;  %v366_v22 = vpop.xlane.xlu0 %365 }
 0x309   :  { %v378_v23 = vmul.f32 0.03125, %v366_v22 }
 0x30a   :  { %v383_v25 = vmul.f32 %v379_v21, %v379_v21  ;;  %v389_v36 = vsub.f32 %v363_v8, %v379_v21 }
 0x30b   :  { %v377_v24 = vpop.xlane.xlu1 %376  ;;  %v382_v28 = vmul.f32 %v378_v23, %v378_v23  ;;  %v388_v38 = vsub.f32 %v362_v10, %v378_v23 }
 0x30c   :  { %v381_v26 = vmul.f32 0.03125, %v377_v24  ;;  %v374_v27 = vpop.xlane.xlu0 %373 }
 0x30d   :  { %v380_v29 = vmul.f32 0.03125, %v374_v27 }
 0x30e   :  { %v385_v30 = vsub.f32 %v381_v26, %v383_v25 }
 0x30f   :  { %v384_v31 = vsub.f32 %v380_v29, %v382_v28 }
 0x310   :  { %v387_v32 = vmax.f32 %v385_v30, 0.0 }
 0x311   :  { %v386_v33 = vmax.f32 %v384_v31, 0.0 }
 0x312   :  { %v391_v34 = vadd.f32 1e-05, %v387_v32 }
 0x313   :  { %v390_v35 = vadd.f32 1e-05, %v386_v33 }
 0x314   :  { %626 = vrsqrt.f32 %v391_v34  ;;  %v413_v50 = vpop.permute.xlu0 %412 }
 0x315   :  { %628 = vrsqrt.f32 %v390_v35 }
 0x31e   :  { %v627_v37 = vpop.eup %626 }
 0x31f   :  { %v629_v40 = vpop.eup %628  ;;  %v395_v41 = vmul.f32 %v627_v37, %v389_v36 }
 0x320   :  { %v394_v42 = vmul.f32 %v629_v40, %v388_v38 }
 0x321   :  { %v401_v44 = vmul.f32 %v520_v39, %v395_v41 }
 0x322   :  { %v400_v45 = vmul.f32 %v520_v39, %v394_v42 }
 0x323   :  { %v407_v46 = vadd.f32 %v521_v43, %v401_v44 }
 0x324   :  { %v406_v47 = vadd.f32 %v521_v43, %v400_v45 }
 0x326   :  { %v611_v48 = vpack.c.bf16 %v407_v46, %v406_v47 }
 0x328   :  { %613 = vmatpush3.bf16.xpose.msk.msra.mxu1 %vm612_vm8, %v611_v48 }
 0x32f   :  { %584 = vmatmul.mubr.msk.f32.vlgmr.msra.gmra.mrb[2].mxu1 %vm221_vm4, %v408_v49 }
 0x402   :  { %v490_v51 = vpop.f32.mrb[2].mxu1 }
 0x403   :  { %v585_v52 = vpop.f32.mrb[3].mxu1  ;;  %v491_v53 = vadd.f32 %v490_v51, %v413_v50 }
 0x405   :  { %495 = vst.msk [vmem:[#allocation2] sm:$0x1] %vm494_vm9, %v491_v53 }
 0x406   :  { %641 = shalt.err (!%p638_p4)
}
 0x407   :  { %s642_s27 = scalar_lea.hbm %s811_s8, 16 }
 0x408   :  { %p643_p5 = scmp.ne.s32.totalorder %s811_s8, %s642_s27  ;;  %p646_p6 = scmp.lt.u32.totalorder %s642_s27, %s811_s8 }
 0x40a   :  { %p648_p7 = pnand %p646_p6, %p643_p5 }
 0x40c   :  { %651 = shalt.err (!%p648_p7)
}
 0x40d   :  { %505 = dma.vmem_to_hbm [thread:$0]  %s503_s25, 16, %s811_s8, [#allocation3]  }
 0x40e   :  { %652 = dma.done.wait [#allocation3], 16  }
 0x40f   :  { %653 = vsyncadd [#allocation3], 4294967280 }
 0x410   :  { %509 = vsyncpa [#allocation3], 1 }

</bundles_post_ra>
